<compile_context>
chip_gen: v7x
topology: tpu7x:2x2x1
jax: 0.10.0
libtpu: 0.0.40
codegen_flags: <defaults>
</compile_context>

<pallas_src>
import functools

import jax
import jax.numpy as jnp
from jax.experimental import pallas as pl
from jax.experimental.pallas import tpu as pltpu


def _round_up(n, m):
    return ((n + m - 1) // m) * m


def dueling_mlp_kernel(x_ref, w1_ref, b1_ref, w2_ref, b2_ref,
                       wva_ref, bva_ref, q_ref, *, dueling_type):
    x = x_ref[...]

    # Feature MLP: Linear -> ReLU -> Linear -> ReLU.
    # Matmuls accumulate in f32 on the MXU; bias add / ReLU stay f32 on the VPU,
    # cast down only when feeding the next dot (keeps v5e happy, halves vreg use).
    h1 = jnp.dot(x, w1_ref[...], preferred_element_type=jnp.float32) + b1_ref[...]
    h1 = jnp.maximum(h1, 0.0).astype(w2_ref.dtype)
    h2 = jnp.dot(h1, w2_ref[...], preferred_element_type=jnp.float32) + b2_ref[...]
    h2 = jnp.maximum(h2, 0.0).astype(wva_ref.dtype)

    # Fused value|advantage head: one [TILE_B,H] x [H, A+1] matmul instead of
    # a wasted full MXU pass for the 1-wide value head.
    va = jnp.dot(h2, wva_ref[...], preferred_element_type=jnp.float32) + bva_ref[...]
    value = va[:, :1]
    adv = va[:, 1:]

    if dueling_type == "avg":
        adv_ctr = adv - jnp.mean(adv, axis=1, keepdims=True)
    elif dueling_type == "max":
        adv_ctr = adv - jnp.max(adv, axis=1, keepdims=True)
    elif dueling_type == "naive":
        adv_ctr = adv
    else:
        raise ValueError("dueling_type must be one of {'avg','max','naive'}")

    q_ref[...] = (value + adv_ctr).astype(q_ref.dtype)


def prepare_params(params, compute_dtype=jnp.bfloat16):
    """Param-prep: fuse value|advantage weights and cast matmul operands.

    Biases stay float32 (elementwise math runs in f32 inside the kernel).
    """
    wva = jnp.concatenate([params["wv"], params["wa"]], axis=1)   # (H, A+1)
    bva = jnp.concatenate([params["bv"], params["ba"]], axis=1)   # (1, A+1)
    return {
        "w1": params["w1"].astype(compute_dtype),
        "b1": params["b1"].astype(jnp.float32),
        "w2": params["w2"].astype(compute_dtype),
        "b2": params["b2"].astype(jnp.float32),
        "wva": wva.astype(compute_dtype),
        "bva": bva.astype(jnp.float32),
    }


def dueling_mlp(x, prepared, dueling_type="avg", tile_b=256):
    """x: [B, IN]; prepared: output of prepare_params(). Returns q [B, A] f32."""
    B, IN = x.shape
    H = prepared["w1"].shape[1]
    A1 = prepared["wva"].shape[1]
    A = A1 - 1
    compute_dtype = prepared["w1"].dtype

    # Batch tile: multiple of 8 (sublane), no larger than the (padded) batch.
    # Default 256 keeps double-buffered tiles well inside v7x's 64 MiB VMEM.
    tile_b = max(8, min(_round_up(tile_b, 8), _round_up(B, 8)))
    b_pad = _round_up(B, tile_b)

    xc = x.astype(compute_dtype)
    if b_pad != B:
        xc = jnp.pad(xc, ((0, b_pad - B), (0, 0)))

    grid = (b_pad // tile_b,)
    resident = lambda i: (0, 0)   # weights/biases stay in VMEM across grid steps

    itemsize = jnp.dtype(compute_dtype).itemsize
    flops = 2 * b_pad * (IN * H + H * H + H * A1)
    bytes_accessed = (
        b_pad * IN * itemsize                                       # x
        + (IN * H + H * H + H * A1) * itemsize                      # weights
        + (2 * H + A1) * 4                                          # biases (f32)
        + b_pad * A * 4                                             # q out (f32)
    )

    kernel = functools.partial(dueling_mlp_kernel, dueling_type=dueling_type)
    q = pl.pallas_call(
        kernel,
        out_shape=jax.ShapeDtypeStruct((b_pad, A), jnp.float32),
        grid=grid,
        in_specs=[
            pl.BlockSpec((tile_b, IN), lambda i: (i, 0)),   # x tile
            pl.BlockSpec((IN, H), resident),                # w1
            pl.BlockSpec((1, H), resident),                 # b1
            pl.BlockSpec((H, H), resident),                 # w2
            pl.BlockSpec((1, H), resident),                 # b2
            pl.BlockSpec((H, A1), resident),                # fused wv|wa
            pl.BlockSpec((1, A1), resident),                # fused bv|ba
        ],
        out_specs=pl.BlockSpec((tile_b, A), lambda i: (i, 0)),
        compiler_params=pltpu.CompilerParams(
            dimension_semantics=("parallel",),              # shard batch across TCs (v7x)
        ),
        cost_estimate=pl.CostEstimate(
            flops=flops, transcendentals=0, bytes_accessed=bytes_accessed),
    )(xc, prepared["w1"], prepared["b1"], prepared["w2"], prepared["b2"],
      prepared["wva"], prepared["bva"])

    return q[:B]


def dueling_mlp_ref(x, p, dueling_type="avg", compute_dtype=jnp.float32):
    """Pure-JAX reference, emulating the kernel's storage dtype exactly."""
    xd = x.astype(compute_dtype)
    w1 = p["w1"].astype(compute_dtype)
    w2 = p["w2"].astype(compute_dtype)
    wv = p["wv"].astype(compute_dtype)
    wa = p["wa"].astype(compute_dtype)
    h1 = jnp.maximum(jnp.dot(xd, w1, preferred_element_type=jnp.float32) + p["b1"], 0.0)
    h1 = h1.astype(compute_dtype)
    h2 = jnp.maximum(jnp.dot(h1, w2, preferred_element_type=jnp.float32) + p["b2"], 0.0)
    h2 = h2.astype(compute_dtype)
    value = jnp.dot(h2, wv, preferred_element_type=jnp.float32) + p["bv"]
    adv = jnp.dot(h2, wa, preferred_element_type=jnp.float32) + p["ba"]
    if dueling_type == "avg":
        return value + (adv - adv.mean(axis=1, keepdims=True))
    elif dueling_type == "max":
        return value + (adv - adv.max(axis=1, keepdims=True))
    return value + adv


def init_params(key, in_dim, hidden, num_actions):
    ks = jax.random.split(key, 8)
    scale = 0.1
    return {
        "w1": scale * jax.random.normal(ks[0], (in_dim, hidden), jnp.float32),
        "b1": scale * jax.random.normal(ks[1], (1, hidden), jnp.float32),
        "w2": scale * jax.random.normal(ks[2], (hidden, hidden), jnp.float32),
        "b2": scale * jax.random.normal(ks[3], (1, hidden), jnp.float32),
        "wv": scale * jax.random.normal(ks[4], (hidden, 1), jnp.float32),
        "bv": scale * jax.random.normal(ks[5], (1, 1), jnp.float32),
        "wa": scale * jax.random.normal(ks[6], (hidden, num_actions), jnp.float32),
        "ba": scale * jax.random.normal(ks[7], (1, num_actions), jnp.float32),
    }


if __name__ == "__main__":
    B, IN, H, A = 16, 32, 32, 8
    key = jax.random.PRNGKey(0)
    kx, kp = jax.random.split(key)
    x = jax.random.normal(kx, (B, IN), jnp.float32)
    params = init_params(kp, IN, H, A)

    # Primary path: bf16 storage, f32 accumulation, small tile to exercise the grid.
    prep_bf16 = prepare_params(params, jnp.bfloat16)
    q = jax.block_until_ready(dueling_mlp(x, prep_bf16, "avg", tile_b=8))
    q_ref = dueling_mlp_ref(x, params, "avg", jnp.bfloat16)
    assert q.shape == (B, A)
    assert jnp.allclose(q, q_ref, atol=1e-3, rtol=1e-3), "bf16 path mismatch vs reference"

    # f32 path check against full-precision reference (module semantics).
    prep_f32 = prepare_params(params, jnp.float32)
    q32 = jax.block_until_ready(dueling_mlp(x, prep_f32, "avg", tile_b=8))
    q32_ref = dueling_mlp_ref(x, params, "avg", jnp.float32)
    assert jnp.allclose(q32, q32_ref, atol=1e-3, rtol=1e-3), "f32 path mismatch vs reference"

    # Also sanity-check the 'max' dueling variant.
    qm = jax.block_until_ready(dueling_mlp(x, prep_f32, "max", tile_b=8))
    qm_ref = dueling_mlp_ref(x, params, "max", jnp.float32)
    assert jnp.allclose(qm, qm_ref, atol=1e-3, rtol=1e-3), "'max' variant mismatch"

    print("KERNEL_OK")
</pallas_src>

<mosaic_0001>
module attributes {stable_mosaic.version = 11 : i64} {
  func.func @dueling_mlp_kernel(%arg0: i32, %arg1: memref<8x32xbf16, #tpu.memory_space<vmem>>, %arg2: memref<32x32xbf16, #tpu.memory_space<vmem>>, %arg3: memref<1x32xf32, #tpu.memory_space<vmem>>, %arg4: memref<32x32xbf16, #tpu.memory_space<vmem>>, %arg5: memref<1x32xf32, #tpu.memory_space<vmem>>, %arg6: memref<32x9xbf16, #tpu.memory_space<vmem>>, %arg7: memref<1x9xf32, #tpu.memory_space<vmem>>, %arg8: memref<8x8xf32, #tpu.memory_space<vmem>>) attributes {dimension_semantics = [#tpu.dimension_semantics<parallel>], iteration_bounds = array<i64: 2>, scalar_prefetch = 0 : i64, scratch_operands = 0 : i64, tpu.core_type = #tpu.core_type<tc>, window_params = [{transform_indices = @transform_0, window_bounds = array<i64: 8, 32>}, {pipeline_mode = #tpu.pipeline_mode<synchronous>, transform_indices = @transform_1, window_bounds = array<i64: 32, 32>}, {pipeline_mode = #tpu.pipeline_mode<synchronous>, transform_indices = @transform_2, window_bounds = array<i64: 1, 32>}, {pipeline_mode = #tpu.pipeline_mode<synchronous>, transform_indices = @transform_3, window_bounds = array<i64: 32, 32>}, {pipeline_mode = #tpu.pipeline_mode<synchronous>, transform_indices = @transform_4, window_bounds = array<i64: 1, 32>}, {pipeline_mode = #tpu.pipeline_mode<synchronous>, transform_indices = @transform_5, window_bounds = array<i64: 32, 9>}, {pipeline_mode = #tpu.pipeline_mode<synchronous>, transform_indices = @transform_6, window_bounds = array<i64: 1, 9>}, {transform_indices = @transform_7, window_bounds = array<i64: 8, 8>}]} {
    %c0 = arith.constant 0 : index
    %c0_0 = arith.constant 0 : index
    %0 = vector.load %arg1[%c0, %c0_0] : memref<8x32xbf16, #tpu.memory_space<vmem>>, vector<8x32xbf16>
    %c0_1 = arith.constant 0 : index
    %c0_2 = arith.constant 0 : index
    %1 = vector.load %arg2[%c0_1, %c0_2] : memref<32x32xbf16, #tpu.memory_space<vmem>>, vector<32x32xbf16>
    %cst = arith.constant dense<0.000000e+00> : vector<8x32xf32>
    %2 = tpu.matmul %0, %1, %cst {dimension_numbers = #tpu.dot_dimension_numbers<[1], [0], [0], [1], [0, 0, 1, 1], [], []>} : vector<8x32xbf16>, vector<32x32xbf16>, vector<8x32xf32> -> vector<8x32xf32>
    %c0_3 = arith.constant 0 : index
    %c0_4 = arith.constant 0 : index
    %3 = vector.load %arg3[%c0_3, %c0_4] : memref<1x32xf32, #tpu.memory_space<vmem>>, vector<1x32xf32>
    %4 = vector.broadcast %3 : vector<1x32xf32> to vector<8x32xf32>
    %5 = arith.addf %2, %4 : vector<8x32xf32>
    %cst_5 = arith.constant 0.000000e+00 : f32
    %6 = vector.broadcast %cst_5 : f32 to vector<8x32xf32>
    %7 = arith.maximumf %5, %6 : vector<8x32xf32>
    %8 = arith.truncf %7 : vector<8x32xf32> to vector<8x32xbf16>
    %c0_6 = arith.constant 0 : index
    %c0_7 = arith.constant 0 : index
    %9 = vector.load %arg4[%c0_6, %c0_7] : memref<32x32xbf16, #tpu.memory_space<vmem>>, vector<32x32xbf16>
    %cst_8 = arith.constant dense<0.000000e+00> : vector<8x32xf32>
    %10 = tpu.matmul %8, %9, %cst_8 {dimension_numbers = #tpu.dot_dimension_numbers<[1], [0], [0], [1], [0, 0, 1, 1], [], []>} : vector<8x32xbf16>, vector<32x32xbf16>, vector<8x32xf32> -> vector<8x32xf32>
    %c0_9 = arith.constant 0 : index
    %c0_10 = arith.constant 0 : index
    %11 = vector.load %arg5[%c0_9, %c0_10] : memref<1x32xf32, #tpu.memory_space<vmem>>, vector<1x32xf32>
    %12 = vector.broadcast %11 : vector<1x32xf32> to vector<8x32xf32>
    %13 = arith.addf %10, %12 : vector<8x32xf32>
    %cst_11 = arith.constant 0.000000e+00 : f32
    %14 = vector.broadcast %cst_11 : f32 to vector<8x32xf32>
    %15 = arith.maximumf %13, %14 : vector<8x32xf32>
    %16 = arith.truncf %15 : vector<8x32xf32> to vector<8x32xbf16>
    %c0_12 = arith.constant 0 : index
    %c0_13 = arith.constant 0 : index
    %17 = vector.load %arg6[%c0_12, %c0_13] : memref<32x9xbf16, #tpu.memory_space<vmem>>, vector<32x9xbf16>
    %cst_14 = arith.constant dense<0.000000e+00> : vector<8x9xf32>
    %18 = tpu.matmul %16, %17, %cst_14 {dimension_numbers = #tpu.dot_dimension_numbers<[1], [0], [0], [1], [0, 0, 1, 1], [], []>} : vector<8x32xbf16>, vector<32x9xbf16>, vector<8x9xf32> -> vector<8x9xf32>
    %c0_15 = arith.constant 0 : index
    %c0_16 = arith.constant 0 : index
    %19 = vector.load %arg7[%c0_15, %c0_16] : memref<1x9xf32, #tpu.memory_space<vmem>>, vector<1x9xf32>
    %20 = vector.broadcast %19 : vector<1x9xf32> to vector<8x9xf32>
    %21 = arith.addf %18, %20 : vector<8x9xf32>
    %22 = vector.extract_strided_slice %21 {offsets = [0, 0], sizes = [8, 1], strides = [1, 1]} : vector<8x9xf32> to vector<8x1xf32>
    %23 = vector.extract_strided_slice %21 {offsets = [0, 1], sizes = [8, 8], strides = [1, 1]} : vector<8x9xf32> to vector<8x8xf32>
    %cst_17 = arith.constant dense<0.000000e+00> : vector<8xf32>
    %24 = vector.multi_reduction <add>, %23, %cst_17 [1] : vector<8x8xf32> to vector<8xf32>
    %25 = vector.shape_cast %24 : vector<8xf32> to vector<8x1xf32>
    %cst_18 = arith.constant 8.000000e+00 : f32
    %26 = vector.broadcast %cst_18 : f32 to vector<8x1xf32>
    %27 = arith.divf %25, %26 : vector<8x1xf32>
    %28 = vector.broadcast %27 : vector<8x1xf32> to vector<8x8xf32>
    %29 = arith.subf %23, %28 : vector<8x8xf32>
    %30 = vector.broadcast %22 : vector<8x1xf32> to vector<8x8xf32>
    %31 = arith.addf %30, %29 : vector<8x8xf32>
    %c0_19 = arith.constant 0 : index
    %c0_20 = arith.constant 0 : index
    %32 = vector.load %arg8[%c0_19, %c0_20] : memref<8x8xf32, #tpu.memory_space<vmem>>, vector<8x8xf32>
    tpu.vector_store %arg8[%c0_19, %c0_20], %31 {strides = array<i32>} : memref<8x8xf32, #tpu.memory_space<vmem>>, vector<8x8xf32>,
    return
  }
  func.func @transform_0(%arg0: i32) -> (i32, i32) {
    %c0_i32 = arith.constant 0 : i32
    %c0_i32_0 = arith.constant 0 : i32
    return %arg0, %c0_i32 : i32, i32
  }
  func.func @transform_1(%arg0: i32) -> (i32, i32) {
    %c0_i32 = arith.constant 0 : i32
    %c0_i32_0 = arith.constant 0 : i32
    %c0_i32_1 = arith.constant 0 : i32
    return %c0_i32, %c0_i32_0 : i32, i32
  }
  func.func @transform_2(%arg0: i32) -> (i32, i32) {
    %c0_i32 = arith.constant 0 : i32
    %c0_i32_0 = arith.constant 0 : i32
    %c0_i32_1 = arith.constant 0 : i32
    return %c0_i32, %c0_i32_0 : i32, i32
  }
  func.func @transform_3(%arg0: i32) -> (i32, i32) {
    %c0_i32 = arith.constant 0 : i32
    %c0_i32_0 = arith.constant 0 : i32
    %c0_i32_1 = arith.constant 0 : i32
    return %c0_i32, %c0_i32_0 : i32, i32
  }
  func.func @transform_4(%arg0: i32) -> (i32, i32) {
    %c0_i32 = arith.constant 0 : i32
    %c0_i32_0 = arith.constant 0 : i32
    %c0_i32_1 = arith.constant 0 : i32
    return %c0_i32, %c0_i32_0 : i32, i32
  }
  func.func @transform_5(%arg0: i32) -> (i32, i32) {
    %c0_i32 = arith.constant 0 : i32
    %c0_i32_0 = arith.constant 0 : i32
    %c0_i32_1 = arith.constant 0 : i32
    return %c0_i32, %c0_i32_0 : i32, i32
  }
  func.func @transform_6(%arg0: i32) -> (i32, i32) {
    %c0_i32 = arith.constant 0 : i32
    %c0_i32_0 = arith.constant 0 : i32
    %c0_i32_1 = arith.constant 0 : i32
    return %c0_i32, %c0_i32_0 : i32, i32
  }
  func.func @transform_7(%arg0: i32) -> (i32, i32) {
    %c0_i32 = arith.constant 0 : i32
    %c0_i32_0 = arith.constant 0 : i32
    return %arg0, %c0_i32 : i32, i32
  }
}

</mosaic_0001>

<bundles_post_ra>
// kernel: tpu_custom_call.1
= control target key start
LH: loop header
LB: loop body
LE: loop exit
PB: predicated region body
PF: predicated region fallthrough
CT: control target
= control target key end

     0   :  { %12 = vsyncpa [#allocation3], 0  ;;  %s939_s0 = inlined_call_operand.hbm [shape: bf16[16,32], index: 0, kind: input, shape index: {}]   ;;  %s940_s1 = inlined_call_operand.vmem [shape: bf16[32,32], index: 1, kind: input, shape index: {}]   ;;  %s941_s2 = inlined_call_operand.vmem [shape: f32[1,32], index: 2, kind: input, shape index: {}]   ;;  %s942_s3 = inlined_call_operand.vmem [shape: bf16[32,32], index: 3, kind: input, shape index: {}]   ;;  %s943_s4 = inlined_call_operand.vmem [shape: f32[1,32], index: 4, kind: input, shape index: {}]   ;;  %s944_s5 = inlined_call_operand.vmem [shape: bf16[32,9], index: 5, kind: input, shape index: {}]   ;;  %s945_s6 = inlined_call_operand.vmem [shape: f32[1,9], index: 6, kind: input, shape index: {}]   ;;  %s946_s7 = inlined_call_operand.vmem [shape: f32[16,8], index: 7, kind: output, shape index: {}]  }
   0x1   :  { %14 = vsyncpa [#allocation3 + $0x1], 0  ;;  %s802_s24 = smov 0   ;;  %s804_s25 = smov 0  }
   0x2   :  { %s806_s26 = smov 0   ;;  %s808_s27 = smov 0  }
   0x3 LB: > { %s821_s28 = sadd.s32 4294967295, %s755_s27   ;;  %s824_s29 = sadd.s32 1, %s755_s27   ;;  %s755_s27 = sphi %s808_s27, %s954_s27   ;;  %s751_s26 = sphi %s806_s26, %s953_s26   ;;  %s747_s25 = sphi %s804_s25, %s952_s25   ;;  %s743_s24 = sphi %s802_s24, %s951_s24  }
   0x4   : > { %s24_s30 = ssub.s32 %s755_s27, %s824_s29  ;;  %s27_s8 = sadd.s32 1, %s751_s26 }
   0x5   : > { %p25_p0 = scmp.eq.s32.totalorder %s24_s30, 0  ;;  %p34_p1 = scmp.ne.s32.totalorder %s751_s26, %s747_s25 }
   0x6   : > { %p35_p2 = scmp.eq.s32.totalorder %s755_s27, 0  ;;  %p40_p3 = scmp.ne.s32.totalorder %s747_s25, %s743_s24 }
   0x7   : > { %s834_s9 = scalar_select %p25_p0, %s751_s26, %s27_s8  }
   0x8   : > { %p36_p4 = por %p35_p2, %p34_p1  ;;  %p41_p5 = scmp.eq.s32.totalorder %s821_s28, 0 }
   0x9   : > { %p646_p6 = scmp.lt.s32.totalorder %s755_s27, 2  ;;  %s234_s11 = sand.u32 1, %s751_s26  }
   0xa   : > { %p838_p7 = por %p41_p5, %p40_p3  ;;  %s588_s12 = sshll.u32 %s234_s11, 2 }
   0xb   : > { %s589_s13 = sshll.u32 %s755_s27, 6  ;;  %s238_s17 = scalar_lea.vmem [#allocation2], %s588_s12 }
   0xc   : > { %s847_s16 = scalar_lea.hbm %s939_s0, %s589_s13  ;;  %s245_s18 = sshll.u32 %s238_s17, 4  ;;  %s849_s18 = int_to_ptr.vmem [resolvable:$true] %s245_s18 }
   0xd   : > { %p851_p8 = pnand %p646_p6, %p36_p4  ;;  %s235_s20 = scalar_lea.sflag [#allocation3], %s234_s11 }
   0xe   : > { %s691_s21 = scalar_lea.hbm %s847_s16, 64  ;;  %s696_s24 = scalar_lea.hbm %s939_s0, 128 }
   0xf   : > { %p692_p11 = scmp.ne.s32.totalorder %s847_s16, %s691_s21  ;;  %p693_p12 = pneg %p851_p8 }
  0x10   : > { %p697_p1 = scmp.lt.u32.totalorder %s847_s16, %s939_s0  ;;  %p698_p2 = scmp.lt.u32.totalorder %s696_s24, %s691_s21 }
  0x11   : > { %p694_p13 = pnand %p693_p12, %p692_p11  ;;  %p700_p4 = scmp.lt.u32.totalorder %s691_s21, %s847_s16 }
  0x12   : > { %p699_p3 = por %p698_p2, %p697_p1 }
  0x13   : > { %p695_p0 = pneg %p694_p13 }
  0x14   : > { %p701_p5 = por %p700_p4, %p699_p3 }
  0x16   : > { %p702_p6 = pnand %p701_p5, %p695_p0 }
  0x18   : > { %705 = shalt.err (!%p702_p6)
}
  0x19   : > { %s706_s11 = scalar_lea.vmem %s849_s18, 64  ;;  %s757_s12 = smov [#allocation2]  }
  0x1a   : > { %p707_p11 = scmp.ne.s32.totalorder %s849_s18, %s706_s11  ;;  %s711_s13 = sshll.u32 %s757_s12, 4  ;;  %s712_s13 = int_to_ptr.vmem [resolvable:$false] %s711_s13 }
  0x1b   : > { %s713_s14 = scalar_lea.vmem %s712_s13, 128  ;;  %p714_p10 = scmp.lt.s32.totalorder %s849_s18, %s712_s13 }
  0x1c   : > { %p709_p13 = pnand %p707_p11, %p693_p12  ;;  %p715_p1 = scmp.lt.s32.totalorder %s713_s14, %s706_s11 }
  0x1e   : > { %p710_p9 = pneg %p709_p13  ;;  %p716_p2 = por %p715_p1, %p714_p10 }
  0x20   : > { %p717_p3 = pnand %p716_p2, %p710_p9 }
  0x22   : > { %720 = shalt.err (!%p717_p3)
}
  0x23   : > { %645 = dma.hbm_to_vmem [thread:$0]  (!%p851_p8), %s847_s16, 64, %s849_s18, %s235_s20  }
  0x24   : > { %p949_p0 = scmp.lt.s32.totalorder %s755_s27, 3  ;;  %p950_p4 = scmp.ge.s32.totalorder %s755_s27, 1 }
  0x26   : > { %p251_p12 = pnand %p950_p4, %p949_p0 }
  0x27   : > { %s256_s15 = sand.u32 (!%p251_p12), 1, %s747_s25  }
  0x28   : > { %254 = sbr.rel (%p251_p12) target bundleno = 1088 (0x440), region = 48  ;;  %s591_s17 = sshll.u32 (!%p251_p12), %s256_s15, 2 }
  0x29   : > { %s257_s21 = scalar_lea.sflag (!%p251_p12), [#allocation3], %s256_s15  ;;  %s260_s22 = scalar_lea.vmem (!%p251_p12), [#allocation2], %s591_s17 }
  0x2f   : > { %738 = dma.done.wait (%p838_p7), %s257_s21, 64  }
  0x30   : > { %740 = vsyncadd (%p838_p7), %s257_s21, 4294967232  ;;  %v758_v0 = vmov 0.0   ;;  %vm759_vm0 = vmmov 0   ;;  %v685_v1 = vld [vmem:[%s940_s1] sm:$0xff]   ;;  %v686_v2 = vld [vmem:[%s940_s1 + $0x8] sm:$0xff]   ;;  %vm319_vm1 = vcmask 261120  }
  0x31   : > { %616 = vmatprep.subr.bf16.mxu0 %v758_v0  ;;  %620 = vmatprep.mubr.msk.bf16.mxu0 %vm759_vm0, %v758_v0  ;;  %v295_v3 = vld [vmem:[%s260_s22] sm:$0xf]  ;;  %v688_v5 = vld [vmem:[%s942_s3 + $0x8] sm:$0xff]   ;;  %v760_v24 = vmov 0   ;;  %s761_s27 = smov 127   ;;  %vm503_vm2 = vcmask 64512  }
  0x32   : > { %624 = vmatprep.subr.bf16.mxu1 %v758_v0  ;;  %628 = vmatprep.mubr.msk.bf16.mxu1 %vm759_vm0, %v758_v0  ;;  %v687_v4 = vld [vmem:[%s942_s3] sm:$0xff]   ;;  %v690_v15 = vld [vmem:[%s944_s5 + $0x8] sm:$0xff]   ;;  %p290_p7 = scmp.lt.s32.totalorder %s821_s28, 1 }
  0x33   : > { %617 = vmatpush3.bf16.msra.mxu0 %v685_v1  ;;  %625 = vmatpush3.bf16.msra.mxu1 %v687_v4  ;;  %v689_v6 = vld [vmem:[%s944_s5] sm:$0xff]  }
  0x34   : > { %618 = vmatprep.subr.bf16.mxu0 %v758_v0  ;;  %626 = vmatprep.subr.bf16.mxu1 %v758_v0  ;;  %v593_v7 = vld [vmem:[%s941_s2] ss:$0 sm:$0xff]  ;;  %s956_s28 = smov (!%p290_p7, %s821_s28), 1 }
  0x35   : > { %v597_v16 = vld [vmem:[%s943_s4] ss:$0 sm:$0xff]  ;;  %683 = vset.pattern.permute.xlu1 %v760_v24  ;;  %684 = vset.pattern.permute.xlu0 %v760_v24  ;;  %s592_s16 = sshll.u32 %s956_s28, 3 }
  0x36   : > { %v601_v25 = vld [vmem:[%s945_s6] ss:$0 sm:$0xff]  ;;  %s293_s10 = scalar_lea.vmem %s946_s7, %s592_s16 }
  0x37   : > { %619 = vmatpush3.bf16.msra.mxu0 %v686_v2  ;;  %627 = vmatpush3.bf16.msra.mxu1 %v688_v5 }
  0x38   : > { %632 = vmatprep.subr.bf16.mxu0 %v758_v0 }
  0x3a   : > { %621 = vmatmul.mubr.msk.bf16.vlgmr.msra.gmra.mrb[0].mxu0 %vm319_vm1, %v295_v3 }
  0x3b   : > { %636 = vmatprep.mubr.msk.bf16.mxu0 %vm759_vm0, %v758_v0  ;;  %633 = vmatpush3.bf16.msra.mxu0 %v689_v6 }
  0x3c   : > { %634 = vmatprep.subr.bf16.mxu0 %v758_v0 }
  0x3f   : > { %635 = vmatpush3.bf16.msra.mxu0 %v690_v15 }
 0x10d   : > { %v357_v8 = vpop.f32.mrb[0].mxu0 }
 0x10e   : > { %v358_v9 = vadd.f32 %v593_v7, %v357_v8  ;;  %v622_v10 = vpop.f32.mrb[1].mxu0 }
 0x10f   : > { %v360_v11 = vpop.f32.mrb[2].mxu0 }
 0x110   : > { %v363_v12 = vmax.f32 %v358_v9, 0.0  ;;  %v623_v13 = vpop.f32.mrb[3].mxu0 }
 0x112   : > { %v364_v14 = vpack.c.bf16 %v363_v12, %v363_v12 }
 0x114   : > { %629 = vmatmul.mubr.msk.bf16.vlgmr.msra.gmra.mrb[0].mxu1 %vm319_vm1, %v364_v14 }
 0x1e7   : > { %v425_v17 = vpop.f32.mrb[0].mxu1 }
 0x1e8   : > { %v426_v18 = vadd.f32 %v597_v16, %v425_v17  ;;  %v630_v19 = vpop.f32.mrb[1].mxu1 }
 0x1e9   : > { %v428_v20 = vpop.f32.mrb[2].mxu1 }
 0x1ea   : > { %v431_v21 = vmax.f32 %v426_v18, 0.0  ;;  %v631_v22 = vpop.f32.mrb[3].mxu1 }
 0x1ec   : > { %v432_v23 = vpack.c.bf16 %v431_v21, %v431_v21 }
 0x1ee   : > { %637 = vmatmul.mubr.msk.bf16.vlgmr.msra.gmra.mrb[4].mxu0 %vm319_vm1, %v432_v23 }
 0x2c1   : > { %v493_v26 = vpop.f32.mrb[4].mxu0 }
 0x2c2   : > { %v494_v27 = vadd.f32 %v601_v25, %v493_v26  ;;  %v638_v28 = vpop.f32.mrb[5].mxu0 }
 0x2c3   : > { %v496_v29 = vpop.f32.mrb[6].mxu0 }
 0x2c4   : > { %511 = vperm.xlu1 %683, %v494_v27   ;;  %500 = vrot.lane.b32.xlu0 %v494_v27, %s761_s27  ;;  %v639_v30 = vpop.f32.mrb[7].mxu0 }
 0x336   : > { %v501_v31 = vpop.permute.xlu0 %500 }
 0x337   : > { %v504_v32 = vsel %vm503_vm2, %v501_v31, 0.0 }
 0x338   : > { %505 = vadd.xlane.f32.xlu0 %v504_v32 }
 0x343   : > { %v512_v36 = vpop.permute.xlu1 %511 }
 0x3c5   : > { %v506_v33 = vpop.xlane.xlu0 %505 }
 0x3c6   : > { %v508_v34 = vmul.f32 0.125, %v506_v33 }
 0x3c8   : > { %v509_v35 = vsub.f32 %v494_v27, %v508_v34 }
 0x3ca   : > { %v514_v37 = vadd.f32 %v512_v36, %v509_v35 }
 0x3cc   : > { %516 = vrot.lane.b32.xlu1 %v514_v37, %s761_s27 }
 0x43e   : > { %v517_v38 = vpop.permute.xlu1 %516 }
 0x43f   : > { %519 = vst.msk [vmem:[%s293_s10] sm:$0xff] %vm503_vm2, %v517_v38 }
 0x440 PF: > { %p17_p8 = scmp.ge.s32.totalorder %s824_s29, 4   ;;  %s951_s24 = smov %s747_s25 }
 0x441   : > { %s952_s25 = smov %s751_s26  ;;  %s953_s26 = smov %s834_s9 }
 0x442   : > { %s954_s27 = smov %s824_s29  ;;  %19 = sbr.rel (!%p17_p8) target bundleno = 3 (0x3), region = 88 }
 0x449   :  { %539 = vsyncpa [#allocation3], 1 }
 0x44a   :  { %541 = vsyncpa [#allocation3 + $0x1], 1 }

</bundles_post_ra>
